<compile_context>
chip_gen: v7x
topology: tpu7x:2x2x1
jax: 0.10.0
libtpu: 0.0.40
codegen_flags: <defaults>
</compile_context>

<pallas_src>
import jax
import jax.numpy as jnp
from jax.experimental import pallas as pl
from jax.experimental.pallas import tpu as pltpu


def _superpose_kernel(w_ref, s_ref, o_ref):
    """Single-invocation weighted sum over the leading axis.

    w_ref: (N,)            f32 weights in SMEM (scalar-indexed).
    s_ref: (N, Dp, Ap)     f32 VMEM block -- all padded sinogram slices.
    o_ref: (Dp, Ap)        f32 VMEM block -- written exactly once.
    """
    n = s_ref.shape[0]
    # N is static and tiny (4): fully unroll the reduction on the VPU.
    acc = w_ref[0] * s_ref[0]
    for i in range(1, n):
        acc = acc + w_ref[i] * s_ref[i]
    o_ref[...] = acc


def find_superposition(weights: jax.Array, sinograms: jax.Array) -> jax.Array:
    """weights: (N,) f32, sinograms: (N, D, A) f32 -> (D, A) f32."""
    n, d, a = sinograms.shape

    # Pad to a lane-dense / sublane-aligned slab: last dim -> multiple of 128,
    # second-to-last -> multiple of 8.  Pad in the wrapper, slice back after.
    a_pad = ((a + 127) // 128) * 128
    d_pad = ((d + 7) // 8) * 8
    s = sinograms
    if a_pad != a or d_pad != d:
        s = jnp.pad(s, ((0, 0), (0, d_pad - d), (0, a_pad - a)))

    out = pl.pallas_call(
        _superpose_kernel,
        out_shape=jax.ShapeDtypeStruct((d_pad, a_pad), jnp.float32),
        in_specs=[
            # full weight vector in SMEM; kernel reads scalars w_ref[i]
            pl.BlockSpec(memory_space=pltpu.MemorySpace.SMEM),
            # entire padded sinogram stack as one VMEM block (fits easily)
            pl.BlockSpec(memory_space=pltpu.MemorySpace.VMEM),
        ],
        out_specs=pl.BlockSpec(memory_space=pltpu.MemorySpace.VMEM),
    )(weights, s)

    # NOTE: for realistic sinogram sizes, add a "parallel" grid axis tiling D
    # (dimension_semantics=("parallel","arbitrary")) and budget tiles against
    # v7x's 64 MiB VMEM; at the shipped shapes a single block is optimal.
    return out[:d, :a]


def find_superposition_ref(weights: jax.Array, sinograms: jax.Array) -> jax.Array:
    """Pure-JAX reference of the PyTorch forward loop."""
    return jnp.sum(weights[:, None, None] * sinograms, axis=0)


if __name__ == "__main__":
    key = jax.random.PRNGKey(0)
    k_w, k_s = jax.random.split(key)

    # Small, module-consistent shapes:
    #   60 projection angles (np.arange(0, 60, 1)), 16 detector bins, 4 base matrices.
    num_bases = 4
    num_detectors = 16
    num_angles = 60

    # torch.nn.Parameter(torch.rand(len(base_matrices))) -> uniform [0, 1)
    weights = jax.random.uniform(k_w, (num_bases,), dtype=jnp.float32)
    sinograms = jax.random.normal(
        k_s, (num_bases, num_detectors, num_angles), dtype=jnp.float32
    )

    out = find_superposition(weights, sinograms)
    out = jax.block_until_ready(out)

    ref = find_superposition_ref(weights, sinograms)
    assert out.shape == (num_detectors, num_angles)
    assert out.dtype == jnp.float32
    assert jnp.allclose(out, ref, atol=1e-5, rtol=1e-5)

    print("KERNEL_OK")
</pallas_src>

<mosaic_0001>
module attributes {stable_mosaic.version = 11 : i64} {
  func.func @_superpose_kernel(%arg0: memref<4xf32, #tpu.memory_space<smem>>, %arg1: memref<4x16x128xf32, #tpu.memory_space<vmem>>, %arg2: memref<16x128xf32, #tpu.memory_space<vmem>>) attributes {dimension_semantics = [], scalar_prefetch = 0 : i64, scratch_operands = 0 : i64, tpu.core_type = #tpu.core_type<tc>} {
    %c0 = arith.constant 0 : index
    %0 = memref.load %arg0[%c0] : memref<4xf32, #tpu.memory_space<smem>>
    %c0_0 = arith.constant 0 : index
    %c0_1 = arith.constant 0 : index
    %c0_2 = arith.constant 0 : index
    %1 = vector.load %arg1[%c0_0, %c0_1, %c0_2] : memref<4x16x128xf32, #tpu.memory_space<vmem>>, vector<1x16x128xf32>
    %2 = vector.shape_cast %1 : vector<1x16x128xf32> to vector<16x128xf32>
    %3 = vector.broadcast %0 : f32 to vector<16x128xf32>
    %4 = arith.mulf %3, %2 : vector<16x128xf32>
    %c1 = arith.constant 1 : index
    %5 = memref.load %arg0[%c1] : memref<4xf32, #tpu.memory_space<smem>>
    %c1_3 = arith.constant 1 : index
    %c0_4 = arith.constant 0 : index
    %c0_5 = arith.constant 0 : index
    %6 = vector.load %arg1[%c1_3, %c0_4, %c0_5] : memref<4x16x128xf32, #tpu.memory_space<vmem>>, vector<1x16x128xf32>
    %7 = vector.shape_cast %6 : vector<1x16x128xf32> to vector<16x128xf32>
    %8 = vector.broadcast %5 : f32 to vector<16x128xf32>
    %9 = arith.mulf %8, %7 : vector<16x128xf32>
    %10 = arith.addf %4, %9 : vector<16x128xf32>
    %c2 = arith.constant 2 : index
    %11 = memref.load %arg0[%c2] : memref<4xf32, #tpu.memory_space<smem>>
    %c2_6 = arith.constant 2 : index
    %c0_7 = arith.constant 0 : index
    %c0_8 = arith.constant 0 : index
    %12 = vector.load %arg1[%c2_6, %c0_7, %c0_8] : memref<4x16x128xf32, #tpu.memory_space<vmem>>, vector<1x16x128xf32>
    %13 = vector.shape_cast %12 : vector<1x16x128xf32> to vector<16x128xf32>
    %14 = vector.broadcast %11 : f32 to vector<16x128xf32>
    %15 = arith.mulf %14, %13 : vector<16x128xf32>
    %16 = arith.addf %10, %15 : vector<16x128xf32>
    %c3 = arith.constant 3 : index
    %17 = memref.load %arg0[%c3] : memref<4xf32, #tpu.memory_space<smem>>
    %c3_9 = arith.constant 3 : index
    %c0_10 = arith.constant 0 : index
    %c0_11 = arith.constant 0 : index
    %18 = vector.load %arg1[%c3_9, %c0_10, %c0_11] : memref<4x16x128xf32, #tpu.memory_space<vmem>>, vector<1x16x128xf32>
    %19 = vector.shape_cast %18 : vector<1x16x128xf32> to vector<16x128xf32>
    %20 = vector.broadcast %17 : f32 to vector<16x128xf32>
    %21 = arith.mulf %20, %19 : vector<16x128xf32>
    %22 = arith.addf %16, %21 : vector<16x128xf32>
    %c0_12 = arith.constant 0 : index
    %c0_13 = arith.constant 0 : index
    %23 = vector.load %arg2[%c0_12, %c0_13] : memref<16x128xf32, #tpu.memory_space<vmem>>, vector<16x128xf32>
    tpu.vector_store %arg2[%c0_12, %c0_13], %22 {strides = array<i32>} : memref<16x128xf32, #tpu.memory_space<vmem>>, vector<16x128xf32>,
    return
  }
}

</mosaic_0001>

<bundles_post_ra>
// kernel: tpu_custom_call.1
= control target key start
LH: loop header
LB: loop body
LE: loop exit
PB: predicated region body
PF: predicated region fallthrough
CT: control target
= control target key end

     0   :  { %7 = vsyncpa [#allocation5], 0  ;;  %s220_s0 = inlined_call_operand.hbm [shape: f32[4], index: 0, kind: input, shape index: {}]   ;;  %s221_s1 = inlined_call_operand.hbm [shape: f32[4,16,128], index: 1, kind: input, shape index: {}]   ;;  %s222_s2 = inlined_call_operand.hbm [shape: f32[16,128], index: 2, kind: output, shape index: {}]  }
   0x1   :  { %8 = vsyncpa [#allocation3], 0 }
   0x2   :  { %9 = vsyncpa [#allocation4], 0  ;;  %s98_s11 = scalar_lea.hbm %s220_s0, 16 }
   0x3   :  { %p99_p0 = scmp.ne.s32.totalorder %s220_s0, %s98_s11  ;;  %p102_p1 = scmp.lt.u32.totalorder %s98_s11, %s220_s0 }
   0x5   :  { %p104_p2 = pnand %p102_p1, %p99_p0 }
   0x7   :  { %107 = shalt.err (!%p104_p2)
}
   0x8   :  { %s158_s16 = smov [#allocation2]   ;;  %s159_s19 = smov [#allocation6]  }
   0x9   :  { %17 = dma.hbm_to_smem %s220_s0, 16, %s158_s16, [#allocation5]  }
   0xa   :  { %s23_s20 = sshll.u32 %s159_s19, 4  ;;  %s108_s23 = scalar_lea.hbm %s221_s1, 1024  ;;  %s24_s20 = int_to_ptr.vmem [resolvable:$true] %s23_s20 }
   0xb   :  { %p109_p3 = scmp.ne.s32.totalorder %s221_s1, %s108_s23  ;;  %p112_p4 = scmp.lt.u32.totalorder %s108_s23, %s221_s1 }
   0xd   :  { %p114_p5 = pnand %p112_p4, %p109_p3 }
   0xf   :  { %117 = shalt.err (!%p114_p5)
}
  0x10   :  { %s118_s28 = scalar_lea.vmem %s24_s20, 1024  ;;  %p123_p7 = scmp.lt.s32.totalorder %s24_s20, %s24_s20 }
  0x11   :  { %p119_p6 = scmp.ne.s32.totalorder %s24_s20, %s118_s28  ;;  %p124_p8 = scmp.lt.s32.totalorder %s118_s28, %s118_s28 }
  0x13   :  { %p125_p9 = por %p124_p8, %p123_p7 }
  0x15   :  { %p126_p10 = pnand %p125_p9, %p119_p6 }
  0x17   :  { %129 = shalt.err (!%p126_p10)
}
  0x18   :  { %s160_s0 = smov 128   ;;  %s161_s29 = smov 8  }
  0x19   :  { %29 = dma.hbm_to_vmem [thread:$0]  %s221_s1, 1024, %s24_s20, [#allocation3], %s160_s0, %s160_s0, %s161_s29  }
  0x1a   :  { %152 = dma.done.wait [#allocation5], 16  }
  0x1b   :  { %153 = vsyncadd [#allocation5], 4294967280 }
  0x1c   :  { %154 = dma.done.wait [#allocation3], 1024  }
  0x1d   :  { %155 = vsyncadd [#allocation3], 4294966272 }
  0x1e   :  { %36 = sfence }
  0x1f   :  { %s37_s4 = sld [smem:[#allocation2]]  ;;  %s90_s5 = sld [smem:[#allocation2 + $0x1]]  ;;  %v38_v0 = vld [vmem:[#allocation6] sm:$0xff]  ;;  %v45_v1 = vld [vmem:[#allocation6 + $0x10] sm:$0xff]  ;;  %v39_v3 = vld [vmem:[#allocation6 + $0x8] sm:$0xff] }
  0x20   :  { %s91_s6 = sld [smem:[#allocation2 + $0x2]]  ;;  %s92_s7 = sld [smem:[#allocation2 + $0x3]]  ;;  %v54_v2 = vld [vmem:[#allocation6 + $0x20] sm:$0xff]  ;;  %v46_v4 = vld [vmem:[#allocation6 + $0x18] sm:$0xff]  ;;  %v63_v7 = vld [vmem:[#allocation6 + $0x30] sm:$0xff] }
  0x21   :  { %v55_v8 = vld [vmem:[#allocation6 + $0x28] sm:$0xff]  ;;  %v64_v13 = vld [vmem:[#allocation6 + $0x38] sm:$0xff]  ;;  %s162_s1 = smov [#allocation7]  }
  0x22   :  { %s77_s8 = sshll.u32 %s162_s1, 4  ;;  %s78_s8 = int_to_ptr.vmem [resolvable:$true] %s77_s8 }
  0x23   :  { %s130_s9 = scalar_lea.vmem %s78_s8, 256  ;;  %p135_p12 = scmp.lt.s32.totalorder %s78_s8, %s78_s8 }
  0x24   :  { %p131_p11 = scmp.ne.s32.totalorder %s78_s8, %s130_s9  ;;  %p136_p13 = scmp.lt.s32.totalorder %s130_s9, %s130_s9 }
  0x25   :  { %v40_v5 = vstv %s37_s4  ;;  %v47_v6 = vstv %s90_s5 }
  0x26   :  { %v41_v9 = vmul.f32 %v40_v5, %v38_v0  ;;  %v48_v10 = vmul.f32 %v47_v6, %v45_v1  ;;  %v56_v11 = vstv %s91_s6  ;;  %v65_v12 = vstv %s92_s7  ;;  %p137_p0 = por %p136_p13, %p135_p12 }
  0x27   :  { %v57_v14 = vmul.f32 %v56_v11, %v54_v2  ;;  %v42_v15 = vmul.f32 %v40_v5, %v39_v3  ;;  %v49_v16 = vmul.f32 %v47_v6, %v46_v4  ;;  %v66_v18 = vmul.f32 %v65_v12, %v63_v7 }
  0x28   :  { %v50_v17 = vadd.f32 %v48_v10, %v41_v9  ;;  %v58_v19 = vmul.f32 %v56_v11, %v55_v8  ;;  %v67_v21 = vmul.f32 %v65_v12, %v64_v13  ;;  %p138_p1 = pnand %p137_p0, %p131_p11 }
  0x29   :  { %v51_v20 = vadd.f32 %v49_v16, %v42_v15 }
  0x2a   :  { %v59_v22 = vadd.f32 %v57_v14, %v50_v17 }
  0x2b   :  { %v60_v23 = vadd.f32 %v58_v19, %v51_v20 }
  0x2c   :  { %v68_v24 = vadd.f32 %v66_v18, %v59_v22 }
  0x2d   :  { %v69_v25 = vadd.f32 %v67_v21, %v60_v23 }
  0x2e   :  { %70 = vst [vmem:[#allocation7] sm:$0xff] %v68_v24 }
  0x2f   :  { %71 = vst [vmem:[#allocation7 + $0x8] sm:$0xff] %v69_v25 }
  0x30   :  { %141 = shalt.err (!%p138_p1)
}
  0x31   :  { %s142_s12 = scalar_lea.hbm %s222_s2, 256 }
  0x32   :  { %p143_p2 = scmp.ne.s32.totalorder %s222_s2, %s142_s12  ;;  %p146_p3 = scmp.lt.u32.totalorder %s142_s12, %s222_s2 }
  0x34   :  { %p148_p4 = pnand %p146_p3, %p143_p2 }
  0x36   :  { %151 = shalt.err (!%p148_p4)
}
  0x37   :  { %83 = dma.vmem_to_hbm [thread:$0]  %s78_s8, 256, %s222_s2, [#allocation4], %s160_s0, %s160_s0, %s161_s29  }
  0x38   :  { %156 = dma.done.wait [#allocation4], 256  }
  0x39   :  { %157 = vsyncadd [#allocation4], 4294967040 }
  0x3a   :  { %87 = vsyncpa [#allocation3], 1 }
  0x3b   :  { %88 = vsyncpa [#allocation4], 1 }
  0x3c   :  { %89 = vsyncpa [#allocation5], 1 }

</bundles_post_ra>
